<compile_context>
chip_gen: v7x
topology: tpu7x:2x2x1
jax: 0.10.0
libtpu: 0.0.40
codegen_flags: <defaults>
</compile_context>

<pallas_src>
import math
from dataclasses import dataclass

import numpy as np
import jax
import jax.numpy as jnp
from jax.experimental import pallas as pl
from jax.experimental.pallas import tpu as pltpu

# ROTATION_MATRICES is a module-level constant in the original code that is not provided.
# We use the standard hexagonal cube-coordinate rotation: one 60-degree step maps
# (x, y, z) -> (-z, -x, -y); ROTATION_MATRICES[k] = that matrix to the k-th power.
_R1 = np.array([[0, 0, -1],
                [-1, 0, 0],
                [0, -1, 0]], dtype=np.int64)
ROTATION_MATRICES = np.stack(
    [np.linalg.matrix_power(_R1, k) for k in range(6)]).astype(np.int32)


@dataclass
class Pose:
    position: jnp.ndarray     # (B, 2) int32 offset coordinates (q, r)
    orientation: jnp.ndarray  # (B,)   float32 radians


@dataclass
class AxialMapBounds:
    u_min: jnp.ndarray
    u_max: jnp.ndarray
    v_min: jnp.ndarray
    v_max: jnp.ndarray


def _permute_kernel(idx_ref, x_ref, out_ref):
    """Single composed permutation as a one-hot matmul.

    idx_ref : (1, M, 1) int32  -- composed output column of source cell m; -1 => dropped
    x_ref   : (1, C, M) model dtype
    out_ref : (1, C, TN) model dtype (TN = lane-dense tile of the padded output width)
    """
    m = x_ref.shape[2]
    tn = out_ref.shape[2]
    col0 = pl.program_id(1) * tn
    cols = jax.lax.broadcasted_iota(jnp.int32, (m, tn), 1) + col0
    # One-hot built in VMEM from M int32 indices (no dense scatter matrices in HBM).
    onehot = (idx_ref[0] == cols).astype(x_ref.dtype)              # (M, TN)
    out_ref[0] = jnp.dot(x_ref[0], onehot,
                         preferred_element_type=jnp.float32).astype(out_ref.dtype)


def _round_up(x: int, m: int) -> int:
    return ((x + m - 1) // m) * m


def _pick_out_tile(n_pad: int, batch: int) -> int:
    # Prefer big lane-dense output tiles, but keep >= 4 total grid steps so both v7x
    # TensorCores get work (and per-step overhead pipelines) even for batch 1-2.
    for tn in (512, 256, 128):
        if n_pad % tn == 0 and (batch * (n_pad // tn) >= 4 or tn == 128):
            return tn
    return n_pad


class AxialTranslatorRotator:
    """JAX/Pallas port of the PyTorch AxialTranslatorRotator (translate=True)."""

    def __init__(self, env_edge_size: int, num_channels: int, translate: bool = True):
        # TODO(synk): translate=False branch (per-batch dynamic-slice placement) not implemented;
        #             only the default translate=True path is reproduced.
        assert translate, "only translate=True is implemented"
        self._edge = env_edge_size
        self._add = (env_edge_size - 1) // 2
        self._axial = env_edge_size + self._add
        self._num_channels = num_channels
        self._W2 = 2 * self._axial + 1

    def resulting_width(self) -> int:
        return self._W2

    def __call__(self, axial_tensor: jnp.ndarray, target_poses: Pose):
        edge, add, axial, W2 = self._edge, self._add, self._axial, self._W2
        center = axial
        B, C, H, W = axial_tensor.shape
        assert H == axial and W == edge, (H, W, axial, edge)
        M = H * W
        N = W2 * W2
        n_pad = _round_up(N, 128)
        tn = _pick_out_tile(n_pad, B)

        q0 = target_poses.position[:, 0].astype(jnp.int32)
        r0 = target_poses.position[:, 1].astype(jnp.int32)
        # NOTE: floor division, matching current torch `//` (floor_divide) semantics.
        u0 = q0 - r0 // 2

        # ------- bounds (AxialMapBounds) -------
        u_min = edge - u0
        v_min = axial - r0
        bounds = AxialMapBounds(u_min, u_min + H, v_min, v_min + W)

        # ------- composed translate + mask + rotate target index (tiny int index glue) -------
        jr = jnp.arange(H, dtype=jnp.int32)[None, :, None]           # source rows (axial height)
        ic = jnp.arange(W, dtype=jnp.int32)[None, None, :]           # source cols (edge width)
        t_row = jr - u0[:, None, None] + edge                        # translated row (B, H, 1)
        t_col = ic - r0[:, None, None] + axial                       # translated col (B, 1, W)
        in_range = ((t_row >= 0) & (t_row < W2) &
                    (t_col >= 0) & (t_col < W2))                     # (B, H, W)

        # Hex mask folded analytically: a translated cell is kept iff 0 <= j + i//2 - add < edge
        # (pose terms cancel, so no (B, N) mask tensor is needed).
        a_idx = jr + ic // 2 - add                                   # (1, H, W)
        masked = (a_idx >= 0) & (a_idx < edge)

        # Rotate the translated (row, col) via cube coordinates, per batch.
        k = jnp.floor(target_poses.orientation / math.radians(60)).astype(jnp.int32) % 6
        Rb = jnp.asarray(ROTATION_MATRICES, jnp.int32)[k]            # (B, 3, 3)
        Ucoord = t_row - center                                      # (B, H, 1)
        Vcoord = t_col - center                                      # (B, 1, W)
        cx = Vcoord
        cy = -(Ucoord + Vcoord)
        cz = Ucoord
        rot_row = (Rb[:, 2, 0, None, None] * cx + Rb[:, 2, 1, None, None] * cy +
                   Rb[:, 2, 2, None, None] * cz) + center            # (B, H, W)
        rot_col = (Rb[:, 0, 0, None, None] * cx + Rb[:, 0, 1, None, None] * cy +
                   Rb[:, 0, 2, None, None] * cz) + center            # (B, H, W)
        valid = (in_range & masked &
                 (rot_row >= 0) & (rot_row < W2) &
                 (rot_col >= 0) & (rot_col < W2))
        combined = jnp.where(valid, rot_row * W2 + rot_col, -1)
        combined = combined.reshape(B, M, 1).astype(jnp.int32)       # (B, M, 1)

        # ------- Pallas kernel: one one-hot-permutation matmul per (batch, out tile) -------
        x_flat = axial_tensor.reshape(B, C, M)                       # keep model dtype (no f32 cast)
        out_flat = pl.pallas_call(
            _permute_kernel,
            out_shape=jax.ShapeDtypeStruct((B, C, n_pad), axial_tensor.dtype),
            grid=(B, n_pad // tn),
            in_specs=[pl.BlockSpec((1, M, 1), lambda i, j: (i, 0, 0)),
                      pl.BlockSpec((1, C, M), lambda i, j: (i, 0, 0))],
            out_specs=pl.BlockSpec((1, C, tn), lambda i, j: (i, 0, j)),
            compiler_params=pltpu.CompilerParams(
                dimension_semantics=("parallel", "parallel")),
        )(combined, x_flat)

        placeholder = out_flat[:, :, :N].reshape(B, C, W2, W2)
        return placeholder, bounds


def _reference_numpy(x, position, orientation, edge):
    """Direct (loop-based) reproduction of the PyTorch forward, for verification."""
    x = np.asarray(x, np.float32)
    position = np.asarray(position)
    orientation = np.asarray(orientation)
    add = (edge - 1) // 2
    axial = edge + add
    W2 = 2 * axial + 1
    center = axial
    B, C, H, W = x.shape
    q0, r0 = position[:, 0], position[:, 1]
    u0 = q0 - r0 // 2
    trans = np.zeros((B, C, W2, W2), np.float32)
    for bb in range(B):
        for j in range(H):
            for i in range(W):
                trans[bb, :, j - u0[bb] + edge, i - r0[bb] + axial] = x[bb, :, j, i]
    u_min = edge - u0
    v_min = axial - r0
    mask = np.zeros((B, W2, W2), bool)
    for bb in range(B):
        for a in range(edge):
            for b2 in range(edge):
                mask[bb, a - b2 // 2 + add + u_min[bb], b2 + v_min[bb]] = True
    out = np.zeros((B, C, W2, W2), np.float32)
    for bb in range(B):
        kk = int(np.floor(orientation[bb] / math.radians(60))) % 6
        R = ROTATION_MATRICES[kk]
        for r in range(W2):
            for c in range(W2):
                if not mask[bb, r, c]:
                    continue
                U, V = r - center, c - center
                rc = R @ np.array([V, -(U + V), U])
                out[bb, :, rc[2] + center, rc[0] + center] = trans[bb, :, r, c]
    return out


if __name__ == "__main__":
    key = jax.random.PRNGKey(0)
    env_edge_size = 5          # -> axial map is 7 x 5, output placeholder is 15 x 15
    num_channels = 4
    batch = 2
    axial_h = env_edge_size + (env_edge_size - 1) // 2
    axial_w = env_edge_size

    k1, _ = jax.random.split(key)
    axial_tensor = jax.random.normal(
        k1, (batch, num_channels, axial_h, axial_w), dtype=jnp.float32)
    position = jnp.array([[1, 2], [3, 4]], dtype=jnp.int32)          # (q, r) offsets
    orientation = jnp.array([1.1, 4.3], dtype=jnp.float32)           # radians
    poses = Pose(position=position, orientation=orientation)

    module = AxialTranslatorRotator(env_edge_size, num_channels, translate=True)
    placeholder, bounds = module(axial_tensor, poses)
    placeholder = jax.block_until_ready(placeholder)

    ref = _reference_numpy(axial_tensor, position, orientation, env_edge_size)
    np.testing.assert_allclose(np.asarray(placeholder), ref, atol=1e-5, rtol=1e-5)
    assert placeholder.shape == (batch, num_channels,
                                 module.resulting_width(), module.resulting_width())
    _ = jax.block_until_ready(bounds.u_min)

    print("KERNEL_OK")
</pallas_src>

<mosaic_0001>
module attributes {stable_mosaic.version = 11 : i64} {
  func.func @_permute_kernel(%arg0: i32, %arg1: i32, %arg2: memref<1x35x1xi32, #tpu.memory_space<vmem>>, %arg3: memref<1x4x35xf32, #tpu.memory_space<vmem>>, %arg4: memref<1x4x128xf32, #tpu.memory_space<vmem>>) attributes {dimension_semantics = [#tpu.dimension_semantics<parallel>, #tpu.dimension_semantics<parallel>], iteration_bounds = array<i64: 2, 2>, scalar_prefetch = 0 : i64, scratch_operands = 0 : i64, tpu.core_type = #tpu.core_type<tc>, window_params = [{transform_indices = @transform_0, window_bounds = array<i64: 1, 35, 1>}, {transform_indices = @transform_1, window_bounds = array<i64: 1, 4, 35>}, {transform_indices = @transform_2, window_bounds = array<i64: 1, 4, 128>}]} {
    %c128_i32 = arith.constant 128 : i32
    %0 = arith.muli %arg1, %c128_i32 : i32
    %1 = tpu.iota {dimensions = array<i32: 1>} : vector<35x128xi32>
    %2 = vector.broadcast %0 : i32 to vector<35x128xi32>
    %3 = arith.addi %1, %2 : vector<35x128xi32>
    %c0 = arith.constant 0 : index
    %c0_0 = arith.constant 0 : index
    %c0_1 = arith.constant 0 : index
    %4 = vector.load %arg2[%c0, %c0_0, %c0_1] : memref<1x35x1xi32, #tpu.memory_space<vmem>>, vector<1x35x1xi32>
    %5 = vector.shape_cast %4 : vector<1x35x1xi32> to vector<35x1xi32>
    %6 = vector.broadcast %5 : vector<35x1xi32> to vector<35x128xi32>
    %7 = arith.cmpi eq, %6, %3 : vector<35x128xi32>
    %8 = arith.extui %7 : vector<35x128xi1> to vector<35x128xi32>
    %9 = arith.sitofp %8 : vector<35x128xi32> to vector<35x128xf32>
    %c0_2 = arith.constant 0 : index
    %c0_3 = arith.constant 0 : index
    %c0_4 = arith.constant 0 : index
    %10 = vector.load %arg3[%c0_2, %c0_3, %c0_4] : memref<1x4x35xf32, #tpu.memory_space<vmem>>, vector<1x4x35xf32>
    %11 = vector.shape_cast %10 : vector<1x4x35xf32> to vector<4x35xf32>
    %cst = arith.constant dense<0.000000e+00> : vector<4x128xf32>
    %12 = tpu.matmul %11, %9, %cst {dimension_numbers = #tpu.dot_dimension_numbers<[1], [0], [0], [1], [0, 0, 1, 1], [], []>} : vector<4x35xf32>, vector<35x128xf32>, vector<4x128xf32> -> vector<4x128xf32>
    %c0_5 = arith.constant 0 : index
    %c0_6 = arith.constant 0 : index
    %c0_7 = arith.constant 0 : index
    %13 = vector.load %arg4[%c0_5, %c0_6, %c0_7] : memref<1x4x128xf32, #tpu.memory_space<vmem>>, vector<1x4x128xf32>
    %14 = vector.shape_cast %13 : vector<1x4x128xf32> to vector<4x128xf32>
    %15 = vector.shape_cast %12 : vector<4x128xf32> to vector<1x4x128xf32>
    tpu.vector_store %arg4[%c0_5, %c0_6, %c0_7], %15 {strides = array<i32>} : memref<1x4x128xf32, #tpu.memory_space<vmem>>, vector<1x4x128xf32>,
    return
  }
  func.func @transform_0(%arg0: i32, %arg1: i32) -> (i32, i32, i32) {
    %c0_i32 = arith.constant 0 : i32
    %c0_i32_0 = arith.constant 0 : i32
    %c0_i32_1 = arith.constant 0 : i32
    return %arg0, %c0_i32, %c0_i32_0 : i32, i32, i32
  }
  func.func @transform_1(%arg0: i32, %arg1: i32) -> (i32, i32, i32) {
    %c0_i32 = arith.constant 0 : i32
    %c0_i32_0 = arith.constant 0 : i32
    %c0_i32_1 = arith.constant 0 : i32
    return %arg0, %c0_i32, %c0_i32_0 : i32, i32, i32
  }
  func.func @transform_2(%arg0: i32, %arg1: i32) -> (i32, i32, i32) {
    %c0_i32 = arith.constant 0 : i32
    %c0_i32_0 = arith.constant 0 : i32
    return %arg0, %c0_i32, %arg1 : i32, i32, i32
  }
}

</mosaic_0001>

<bundles_post_ra>
// kernel: tpu_custom_call.1
= control target key start
LH: loop header
LB: loop body
LE: loop exit
PB: predicated region body
PF: predicated region fallthrough
CT: control target
= control target key end

     0   :  { %7 = vsyncpa [#allocation3], 0  ;;  %s782_s0 = inlined_call_operand.vmem [shape: s32[2,35,1], index: 0, kind: input, shape index: {}]   ;;  %s783_s1 = inlined_call_operand.vmem [shape: f32[2,4,35], index: 1, kind: input, shape index: {}]   ;;  %s784_s2 = inlined_call_operand.hbm [shape: f32[2,4,256], index: 2, kind: output, shape index: {}]  }
   0x1   :  { %9 = vsyncpa [#allocation3 + $0x1], 0  ;;  %s639_s9 = smov 0   ;;  %s641_s10 = smov 0  }
   0x2   :  { %s643_s11 = smov 0   ;;  %s645_s12 = smov 0  }
   0x3   :  { %s647_s13 = smov 0   ;;  %s649_s14 = smov 0  }
   0x4   :  { %s651_s15 = smov 0   ;;  %s653_s16 = smov 0  }
   0x5 LB: > { %s393_s17 = sadd.s32 4294967295, %s616_s16   ;;  %s394_s18 = sadd.s32 4294967294, %s616_s16   ;;  %s616_s16 = sphi %s653_s16, %s15_s16   ;;  %s612_s15 = sphi %s651_s15, %s793_s15   ;;  %s608_s14 = sphi %s649_s14, %s792_s14   ;;  %s604_s13 = sphi %s647_s13, %s791_s13   ;;  %s600_s12 = sphi %s645_s12, %s790_s12   ;;  %s596_s11 = sphi %s643_s11, %s789_s11   ;;  %s592_s10 = sphi %s641_s10, %s788_s10   ;;  %s588_s9 = sphi %s639_s9, %s787_s9  }
   0x6   : > { %s24_s19 = sadd.s32 1, %s608_s14  ;;  %s27_s20 = sadd.s32 1, %s612_s15 }
   0x7   : > { %p25_p0 = scmp.ge.s32.totalorder %s24_s19, 2  ;;  %p98_p1 = scmp.ne.s32.totalorder %s596_s11, %s592_s10 }
   0x8   : > { %p99_p2 = scmp.eq.s32.totalorder %s393_s17, 3  ;;  %p104_p5 = scmp.ne.s32.totalorder %s592_s10, %s588_s9 }
   0x9   : > { %s795_s19 = smov (%p25_p0, %s24_s19), 0  ;;  %s797_s20 = smov (!%p25_p0, %s27_s20), %s612_s15 }
   0xa   : > { %s84_s21 = ssub.s32 %s608_s14, %s795_s19  ;;  %p690_p3 = por %p99_p2, %p98_p1 }
   0xb   : > { %p29_p4 = scmp.ge.s32.totalorder %s797_s20, 2  ;;  %p105_p6 = scmp.eq.s32.totalorder %s394_s18, 3 }
   0xc   : > { %p397_p7 = scmp.ge.s32.totalorder %s616_s16, 1  ;;  %p138_p9 = scmp.lt.s32.totalorder %s616_s16, 5 }
   0xd   : > { %s799_s20 = smov (%p29_p4, %s797_s20), 0  ;;  %p699_p8 = por %p105_p6, %p104_p5 }
   0xe   : > { %s83_s24 = ssub.s32 %s612_s15, %s799_s20  ;;  %s88_s25 = sadd.s32 1, %s596_s11 }
   0xf   : > { %s85_s26 = sor.u32 %s84_s21, %s83_s24  ;;  %p139_p10 = pnand %p397_p7, %p138_p9 }
  0x10   : > { %p86_p11 = scmp.eq.s32.totalorder %s85_s26, 0  ;;  %p164_p12 = scmp.lt.s32.totalorder (!%p139_p10), %s604_s13, 1  ;;  %v618_v0 = vmov (!%p139_p10), 0   ;;  %v619_v6 = vmov (!%p139_p10), 0.0|0.0   ;;  %vm620_vm0 = vmmov (!%p139_p10), 0   ;;  %v621_v7 = vmov (!%p139_p10), 0.0  }
  0x11   : > { %142 = sbr.rel (%p139_p10) target bundleno = 399 (0x18f), region = 28  ;;  %521 = vset.pattern.permute.xlu1 (!%p139_p10), %v618_v0  ;;  %520 = vset.pattern.permute.xlu0 (!%p139_p10), %v618_v0  ;;  %v174_v8 = vlaneseq (!%p139_p10)  ;;  %s401_s5 = sshll.u32 (!%p139_p10), %s600_s12, 7  ;;  %v622_v16 = vmov (!%p139_p10), 1.0|1.0   ;;  %vm218_vm8 = vcmask (!%p139_p10), 1042432   ;;  %vm214_vm9 = vcmask (!%p139_p10), 285696  }
  0x12   : > { %s708_s27 = scalar_select %p86_p11, %s596_s11, %s88_s25  }
  0x13   : > { %437 = vmatprep.subr.bf16.mxu0 (!%p139_p10), %v619_v6  ;;  %434 = vmatprep.mubr.msk.f32.mxu0 (!%p139_p10), %vm620_vm0, %v621_v7  ;;  %v175_v9 = vand.u32 (!%p139_p10), 127, %v174_v8  ;;  %v176_v10 = vstv (!%p139_p10), %s401_s5  ;;  %s161_s18 = sand.u32 (!%p139_p10), 1, %s592_s10   ;;  %s414_s24 = sshll.u32 (!%p139_p10), %s604_s13, 1 }
  0x14   : > { %s398_s21 = sshll.u32 (!%p139_p10), %s161_s18, 2  ;;  %s305_s25 = sadd.s32 (!%p139_p10), %s600_s12, %s414_s24 }
  0x15   : > { %v177_v13 = vadd.s32 (!%p139_p10), %v176_v10, %v175_v9  ;;  %s163_s26 = scalar_lea.vmem (!%p139_p10), [#allocation2], %s398_s21  ;;  %s294_s5 = scalar_lea.sflag (!%p139_p10), [#allocation3], %s161_s18 }
  0x16   : > { %s623_s12 = smov (!%p139_p10), [#allocation2]  }
  0x18   : > { %s712_s28 = scalar_select %p164_p12, %s604_s13, 1 }
  0x19   : > { %s526_s13 = sshll.u32 %s623_s12, 4  ;;  %s527_s13 = int_to_ptr.vmem [resolvable:$false] %s526_s13 }
  0x1a   : > { %s443_s29 = smul.u32 40, %s712_s28  ;;  %s400_s6 = sshll.u32 %s712_s28, 2 }
  0x1b   : > { %s172_s17 = scalar_lea.vmem %s783_s1, %s400_s6  ;;  %s309_s28 = sshll.u32 %s163_s26, 4  ;;  %s726_s28 = int_to_ptr.vmem [resolvable:$true] %s309_s28 }
  0x1c   : > { %s168_s4 = scalar_lea.vmem %s782_s0, %s443_s29  ;;  %v213_v18 = vld [vmem:[%s172_s17] sm:$0xf]  ;;  %s415_s29 = sshll.u32 %s305_s25, 6 }
  0x1d   : > { %v180_v1 = vld [vmem:[%s168_s4 + $0x10] sm:$0xff]  ;;  %v178_v2 = vld [vmem:[%s168_s4] sm:$0xff]  ;;  %v181_v3 = vld [vmem:[%s168_s4 + $0x18] sm:$0xff]  ;;  %s522_s6 = scalar_lea.vmem %s726_s28, 64  ;;  %s528_s7 = scalar_lea.vmem %s527_s13, 128 }
  0x1e   : > { %190 = vperm.xlu1 %521, %v180_v1   ;;  %184 = vperm.xlu0 %520, %v178_v2   ;;  %v179_v4 = vld [vmem:[%s168_s4 + $0x8] sm:$0xff]  ;;  %v182_v5 = vld [vmem:[%s168_s4 + $0x20] sm:$0x7]  ;;  %s731_s4 = scalar_lea.hbm %s784_s2, %s415_s29  ;;  %p523_p13 = scmp.ne.s32.totalorder %s726_s28, %s522_s6 }
  0x1f   : > { %p529_p2 = scmp.lt.s32.totalorder %s726_s28, %s527_s13  ;;  %p530_p4 = scmp.lt.s32.totalorder %s528_s7, %s522_s6 }
  0x20   : > { %p524_p0 = pnand %p523_p13, %p690_p3 }
  0x21   : > { %p531_p5 = por %p530_p4, %p529_p2 }
  0x22   : > { %193 = vperm.xlu1 %521, %v181_v3   ;;  %187 = vperm.xlu0 %520, %v179_v4   ;;  %p525_p1 = pneg %p524_p0 }
  0x24   : > { %p532_p6 = pnand %p531_p5, %p525_p1 }
  0x26   : > { %196 = vperm.xlu0 %520, %v182_v5  }
  0x9d   : > { %v191_v11 = vpop.permute.xlu1 %190  ;;  %v185_v12 = vpop.permute.xlu0 %184 }
  0x9e   : > { %vm198_vm2 = vcmp.eq.s32.totalorder %v185_v12, %v177_v13  ;;  %vm200_vm4 = vcmp.eq.s32.totalorder %v191_v11, %v177_v13 }
  0xa1   : > { %v188_v14 = vpop.permute.xlu0 %187  ;;  %v194_v15 = vpop.permute.xlu1 %193 }
  0xa2   : > { %vm199_vm1 = vcmp.eq.s32.totalorder %v188_v14, %v177_v13  ;;  %vm201_vm5 = vcmp.eq.s32.totalorder %v194_v15, %v177_v13 }
  0xa3   : > { %vm438_vm3 = vmpackc.low %vm199_vm1, %vm198_vm2 }
  0xa4   : > { %439 = vmatpush3.bf16.msk.msra.mxu0 %vm438_vm3, %v622_v16  ;;  %vm441_vm6 = vmpackc.low %vm201_vm5, %vm200_vm4 }
  0xa5   : > { %v197_v17 = vpop.permute.xlu0 %196  ;;  %440 = vmatprep.subr.bf16.mxu0 %v619_v6 }
  0xa6   : > { %vm202_vm7 = vcmp.eq.s32.totalorder %v197_v17, %v177_v13 }
  0xa7   : > { %v406_v19 = vsel %vm202_vm7, 1.0, %v621_v7 }
  0xa8   : > { %442 = vmatpush3.bf16.msk.msra.mxu0 %vm441_vm6, %v622_v16 }
  0xa9   : > { %432 = vmatprep.subr.mxu0 %v621_v7 }
  0xac   : > { %433 = vmatpush3.msk.msra.mxu0 %vm218_vm8, %v406_v19 }
  0xad   : > { %435 = vmatmul.mubr.msk.f32.vlgmr.msra.gmra.mrb[0].mxu0 %vm214_vm9, %v213_v18 }
 0x180   : > { %v288_v20 = vpop.f32.mrb[0].mxu0 }
 0x181   : > { %292 = vst [vmem:[%s163_s26] sm:$0xf] %v288_v20  ;;  %v436_v21 = vpop.f32.mrb[1].mxu0 }
 0x182   : > { %535 = shalt.err (!%p532_p6)
}
 0x183   : > { %s536_s8 = scalar_lea.hbm %s731_s4, 64  ;;  %s540_s21 = scalar_lea.hbm %s784_s2, 256 }
 0x184   : > { %p537_p7 = scmp.ne.s32.totalorder %s731_s4, %s536_s8  ;;  %p541_p11 = scmp.lt.u32.totalorder %s731_s4, %s784_s2 }
 0x185   : > { %p542_p12 = scmp.lt.u32.totalorder %s540_s21, %s536_s8  ;;  %p544_p0 = scmp.lt.u32.totalorder %s536_s8, %s731_s4 }
 0x186   : > { %p538_p9 = pnand %p537_p7, %p690_p3 }
 0x187   : > { %p543_p13 = por %p542_p12, %p541_p11 }
 0x188   : > { %p539_p10 = pneg %p538_p9 }
 0x189   : > { %p545_p1 = por %p544_p0, %p543_p13 }
 0x18b   : > { %p546_p2 = pnand %p545_p1, %p539_p10 }
 0x18d   : > { %549 = shalt.err (!%p546_p2)
}
 0x18e   : > { %444 = dma.vmem_to_hbm [thread:$0]  (%p690_p3), %s726_s28, 64, %s731_s4, %s294_s5  }
 0x18f PF: > { %p450_p4 = scmp.ge.s32.totalorder %s616_s16, 2  ;;  %s321_s26 = sand.u32 1, %s588_s9  }
 0x190   : > { %s322_s29 = scalar_lea.sflag [#allocation3], %s321_s26 }
 0x191   : > { %p447_p5 = pnand %p450_p4, %p699_p8 }
 0x193   : > { %583 = dma.done.wait (!%p447_p5), %s322_s29, 64  }
 0x194   : > { %585 = vsyncadd (!%p447_p5), %s322_s29, 4294967232  ;;  %s15_s16 = sadd.s32 1, %s616_s16   ;;  %s787_s9 = smov %s592_s10 }
 0x195   : > { %p12_p6 = scmp.ge.s32.totalorder %s15_s16, 6   ;;  %s788_s10 = smov %s596_s11 }
 0x196   : > { %s789_s11 = smov %s708_s27  ;;  %s790_s12 = smov %s608_s14 }
 0x197   : > { %s791_s13 = smov %s612_s15  ;;  %s792_s14 = smov %s795_s19 }
 0x198   : > { %s793_s15 = smov %s799_s20  ;;  %14 = sbr.rel (!%p12_p6) target bundleno = 5 (0x5), region = 66 }
 0x19f   :  { %327 = vsyncpa [#allocation3], 1 }
 0x1a0   :  { %329 = vsyncpa [#allocation3 + $0x1], 1 }

</bundles_post_ra>
